<compile_context>
chip_gen: v6e
topology: v6e:2x2x1
jax: 0.10.0
libtpu: 0.0.40
codegen_flags: <defaults>
</compile_context>

<pallas_src>
import jax
import jax.numpy as jnp
from jax.experimental import pallas as pl
from jax.experimental.pallas import tpu as pltpu

_LANES = 128
_SUBLANES = 8
_TARGET_BLOCK_BYTES = 4 * 1024 * 1024     # ~4 MiB of each input per pipeline step
_NUM_SPLITS = 2                           # leading grid axis: TensorCore split (v7x)
_FALLBACK_VMEM_LIMIT = 48 * 1024 * 1024
_TRY_CORE_PARALLEL = True                 # fall back to "parallel" if rejected


def _vmem_limit_bytes():
    # ~3/4 of physical VMEM: v5e/v6e (128 MiB) -> 96 MiB, v7x (64 MiB) -> 48 MiB.
    # This comfortably holds the 16 MiB of double-buffered inputs plus Mosaic's
    # large-value temporaries, and fixes v5e's 16 MiB default scoped limit.
    try:
        phys = int(getattr(pltpu.get_tpu_info(), "vmem_capacity_bytes"))
        if phys > 0:
            return min((phys * 3) // 4, 96 * 1024 * 1024)
    except Exception:
        pass
    return _FALLBACK_VMEM_LIMIT


def _make_kernel(block_rows, bpc, total_blocks, rows_valid, needs_tail, needs_skip):
    """Build the streaming-fold kernel, statically specialized on the grid layout.

    Resident per-split accumulators (outputs, revisited across the inner axis):
        sall_ref : (1, 8, 128) f32  partial sums of (x - t)^2   (valid rows)
        sz_ref   : (1, 8, 128) f32  partial sums of (x - t)^2 where t == 0
        cnt_ref  : (1, 8, 128) i32  partial counts of (t == 0)
    """
    g = block_rows // _SUBLANES

    def kernel(x_ref, t_ref, sall_ref, sz_ref, cnt_ref):
        c = pl.program_id(0)          # TensorCore split index
        i = pl.program_id(1)          # block index within this split

        @pl.when(i == 0)
        def _init():
            sall_ref[...] = jnp.zeros_like(sall_ref)
            sz_ref[...] = jnp.zeros_like(sz_ref)
            cnt_ref[...] = jnp.zeros_like(cnt_ref)

        blk = c * bpc + i             # logical (un-clamped) block index

        def fold(masked):
            x = x_ref[...].astype(jnp.float32)
            t = t_ref[...].astype(jnp.float32)
            diff = x - t
            sq = diff * diff
            zmask = t == 0.0
            if masked:
                # Only the single tail block pays for the index/mask work.
                row = (jax.lax.broadcasted_iota(jnp.int32, (block_rows, _LANES), 0)
                       + blk * block_rows)
                valid = row < rows_valid
                zmask = jnp.logical_and(valid, zmask)
                sq_all = jnp.where(valid, sq, 0.0)
            else:
                sq_all = sq
            sq_z = jnp.where(zmask, sq, 0.0)
            cz = zmask.astype(jnp.int32)
            # Fold rows in groups of 8: the reshape is vreg-aligned (no data
            # movement) and the axis-0 sums are pure VPU adds.
            sall_ref[...] += jnp.sum(sq_all.reshape(g, _SUBLANES, _LANES),
                                     axis=0, keepdims=True)
            sz_ref[...] += jnp.sum(sq_z.reshape(g, _SUBLANES, _LANES),
                                   axis=0, keepdims=True)
            cnt_ref[...] += jnp.sum(cz.reshape(g, _SUBLANES, _LANES),
                                    axis=0, keepdims=True)

        if not needs_tail and not needs_skip:
            # Common case: every block is full and real -> no masks, no branches.
            fold(masked=False)
        else:
            last_real = total_blocks - 1
            # Full, real blocks: unmasked fast path.
            fast_pred = (blk < last_real) if needs_tail else (blk < total_blocks)

            @pl.when(fast_pred)
            def _fast():
                fold(masked=False)

            if needs_tail:
                # The single partially-valid block: row-masked path.
                @pl.when(blk == last_real)
                def _tail():
                    fold(masked=True)
            # Overrun blocks (blk >= total_blocks, from clamped DMA indices when
            # the 2-way split doesn't divide the block count) run neither path.

    return kernel


def zero_balance_mse(input_, target, zero_weight, block_rows=None):
    """Forward of Zero_Balance_MSE (reduction='mean')."""
    # TODO(synk): forward value only — pallas_call has no AD rule here, so jax.grad
    # (and the PyTorch .detach() gradient semantics) are not reproduced.
    assert input_.shape == target.shape
    n = input_.size
    x_flat = input_.reshape(-1)
    t_flat = target.reshape(-1)

    n_main = (n // _LANES) * _LANES
    rows = n_main // _LANES

    # Ragged (<128 element) tail: a few plain jnp ops, avoids any whole-array pad.
    if n_main < n:
        xt = x_flat[n_main:].astype(jnp.float32)
        tt = t_flat[n_main:].astype(jnp.float32)
        sqt = (xt - tt) ** 2
        zt = tt == 0.0
        tail_all = jnp.sum(sqt)
        tail_z = jnp.sum(jnp.where(zt, sqt, 0.0))
        tail_cnt = jnp.sum(zt.astype(jnp.int32))
    else:
        tail_all = jnp.float32(0.0)
        tail_z = jnp.float32(0.0)
        tail_cnt = jnp.int32(0)

    if rows == 0:
        sum_all, sum_z, nz_i = tail_all, tail_z, tail_cnt
    else:
        x_main = x_flat if n_main == n else x_flat[:n_main]
        t_main = t_flat if n_main == n else t_flat[:n_main]
        x2 = x_main.reshape(rows, _LANES)      # no copy when n % 128 == 0
        t2 = t_main.reshape(rows, _LANES)

        itemsize = max(jnp.dtype(x2.dtype).itemsize, jnp.dtype(t2.dtype).itemsize)
        if block_rows is None:
            # ~4 MiB per input block: 8192 rows f32, 16384 rows bf16.
            block_rows = _TARGET_BLOCK_BYTES // (_LANES * itemsize)
        block_rows = max(_SUBLANES, (block_rows // _SUBLANES) * _SUBLANES)

        if rows <= block_rows:
            # Single block covers everything; only tiny (< one block) inputs ever
            # pay this sublane-alignment pad (padded rows are masked in-kernel).
            block_rows = pl.cdiv(rows, _SUBLANES) * _SUBLANES
            pad_rows = block_rows - rows
            if pad_rows:
                x2 = jnp.pad(x2, ((0, pad_rows), (0, 0)))
                t2 = jnp.pad(t2, ((0, pad_rows), (0, 0)))
            rows_arr = block_rows
        else:
            rows_arr = rows

        total_blocks = pl.cdiv(rows_arr, block_rows)
        num_splits = min(_NUM_SPLITS, total_blocks)
        bpc = pl.cdiv(total_blocks, num_splits)
        needs_skip = num_splits * bpc != total_blocks
        needs_tail = total_blocks * block_rows != rows

        if needs_skip:
            def in_map(c, i):
                # Clamp so overrun blocks re-read a valid block; kernel skips them.
                return (jnp.minimum(c * bpc + i, total_blocks - 1), 0)
        else:
            def in_map(c, i):
                return (c * bpc + i, 0)

        def out_map(c, i):
            return (c, 0, 0)

        kernel = _make_kernel(block_rows, bpc, total_blocks, rows,
                              needs_tail, needs_skip)

        out_shapes = (
            jax.ShapeDtypeStruct((num_splits, _SUBLANES, _LANES), jnp.float32),
            jax.ShapeDtypeStruct((num_splits, _SUBLANES, _LANES), jnp.float32),
            jax.ShapeDtypeStruct((num_splits, _SUBLANES, _LANES), jnp.int32),
        )

        cost = pl.CostEstimate(
            flops=9 * rows_arr * _LANES,
            transcendentals=0,
            bytes_accessed=(x2.size * jnp.dtype(x2.dtype).itemsize
                            + t2.size * jnp.dtype(t2.dtype).itemsize
                            + 3 * num_splits * _SUBLANES * _LANES * 4),
        )
        vmem_limit = _vmem_limit_bytes()

        def run(dim_sems):
            return pl.pallas_call(
                kernel,
                out_shape=out_shapes,
                grid_spec=pltpu.PrefetchScalarGridSpec(
                    num_scalar_prefetch=0,
                    grid=(num_splits, bpc),
                    in_specs=[
                        pl.BlockSpec((block_rows, _LANES), in_map),
                        pl.BlockSpec((block_rows, _LANES), in_map),
                    ],
                    out_specs=[
                        pl.BlockSpec((1, _SUBLANES, _LANES), out_map),
                        pl.BlockSpec((1, _SUBLANES, _LANES), out_map),
                        pl.BlockSpec((1, _SUBLANES, _LANES), out_map),
                    ],
                ),
                compiler_params=pltpu.CompilerParams(
                    dimension_semantics=dim_sems,
                    vmem_limit_bytes=vmem_limit,
                ),
                cost_estimate=cost,
            )(x2, t2)

        # Prefer CORE_PARALLEL for the leading split so it provably lands on both
        # TensorCores on v7x; fall back to the plain string semantics (known good
        # on 1-TC chips) if the backend rejects it.  NOTE: the fallback relies on
        # eager compilation; call this function un-jitted (as here).
        attempts = []
        core_par = getattr(pltpu, "CORE_PARALLEL", None)
        arb = getattr(pltpu, "ARBITRARY", "arbitrary")
        if _TRY_CORE_PARALLEL and num_splits > 1 and core_par is not None:
            attempts.append((core_par, arb))
        attempts.append(("parallel", "arbitrary"))

        sall = sz = cnt = None
        for idx, sems in enumerate(attempts):
            try:
                sall, sz, cnt = run(sems)
                break
            except Exception:
                if idx == len(attempts) - 1:
                    raise

        sum_all = jnp.sum(sall) + tail_all
        sum_z = jnp.sum(sz) + tail_z
        nz_i = jnp.sum(cnt) + tail_cnt

    nz = nz_i.astype(jnp.float32)
    n_f = jnp.float32(n)
    z_ratio = nz / n_f

    # MSE over masked selections (empty selection -> 0/0 = NaN, matching
    # torch.nn.MSELoss(reduction='mean') on empty tensors).
    mse_z = sum_z / nz
    mse_uz = (sum_all - sum_z) / (n_f - nz)
    comp = sum_all / n_f                      # mse_loss_detach(input, target)

    loss = mse_z * z_ratio * jnp.float32(zero_weight) + mse_uz * (1.0 - z_ratio)
    # Value-wise identical to `loss * (comp.detach() / loss.detach())`;
    # NaN when loss == 0, same as the PyTorch expression.
    loss = loss * (comp / loss)
    return loss


def _reference(input_, target, zero_weight):
    """Pure-JAX reference mirroring the PyTorch forward."""
    x = input_.reshape(-1).astype(jnp.float32)
    t = target.reshape(-1).astype(jnp.float32)
    mask = t == 0.0
    n = x.size
    nz = jnp.sum(mask.astype(jnp.float32))
    sq = (x - t) ** 2
    mse_z = jnp.sum(jnp.where(mask, sq, 0.0)) / nz
    mse_uz = jnp.sum(jnp.where(mask, 0.0, sq)) / (n - nz)
    z_ratio = nz / n
    comp = jnp.mean(sq)
    loss = mse_z * z_ratio * zero_weight + mse_uz * (1 - z_ratio)
    return loss * (comp / loss)


if __name__ == "__main__":
    zero_weight = 2.0
    key = jax.random.PRNGKey(0)
    ks = jax.random.split(key, 9)

    # Case 1: NCHW input, n = 2048 (multiple of 128): zero-copy, single fast block.
    shape1 = (2, 4, 16, 16)
    x1 = jax.random.normal(ks[0], shape1, dtype=jnp.float32)
    tv1 = jax.random.normal(ks[1], shape1, dtype=jnp.float32)
    t1 = jnp.where(jax.random.uniform(ks[2], shape1) < 0.3, 0.0, tv1)
    out1 = jax.block_until_ready(zero_balance_mse(x1, t1, zero_weight))
    ref1 = _reference(x1, t1, zero_weight)
    assert jnp.allclose(out1, ref1, rtol=1e-4, atol=1e-6), (out1, ref1)

    # Case 2: ragged n = 1155: wrapper-folded tail + masked (row-padded) block.
    shape2 = (3, 5, 7, 11)
    x2_ = jax.random.normal(ks[3], shape2, dtype=jnp.float32)
    tv2 = jax.random.normal(ks[4], shape2, dtype=jnp.float32)
    t2_ = jnp.where(jax.random.uniform(ks[5], shape2) < 0.3, 0.0, tv2)
    out2 = jax.block_until_ready(zero_balance_mse(x2_, t2_, zero_weight))
    ref2 = _reference(x2_, t2_, zero_weight)
    assert jnp.allclose(out2, ref2, rtol=1e-4, atol=1e-6), (out2, ref2)

    # Case 3: multi-block, 2-way split, odd block count (fast + tail + skip paths);
    # a small block_rows override keeps the test tiny (n = 30720, 3 blocks of 96 rows).
    shape3 = (2, 3, 40, 128)
    x3 = jax.random.normal(ks[6], shape3, dtype=jnp.float32)
    tv3 = jax.random.normal(ks[7], shape3, dtype=jnp.float32)
    t3 = jnp.where(jax.random.uniform(ks[8], shape3) < 0.3, 0.0, tv3)
    out3 = jax.block_until_ready(zero_balance_mse(x3, t3, zero_weight, block_rows=96))
    ref3 = _reference(x3, t3, zero_weight)
    assert jnp.allclose(out3, ref3, rtol=1e-4, atol=1e-6), (out3, ref3)

    print("KERNEL_OK")
</pallas_src>

<mosaic_0001>
module attributes {stable_mosaic.version = 11 : i64} {
  func.func @kernel(%arg0: i32, %arg1: i32, %arg2: memref<16x128xf32, #tpu.memory_space<vmem>>, %arg3: memref<16x128xf32, #tpu.memory_space<vmem>>, %arg4: memref<1x8x128xf32, #tpu.memory_space<vmem>>, %arg5: memref<1x8x128xf32, #tpu.memory_space<vmem>>, %arg6: memref<1x8x128xi32, #tpu.memory_space<vmem>>) attributes {dimension_semantics = [#tpu.dimension_semantics<parallel>, #tpu.dimension_semantics<arbitrary>], iteration_bounds = array<i64: 1, 1>, scalar_prefetch = 0 : i64, scratch_operands = 0 : i64, tpu.core_type = #tpu.core_type<tc>, window_params = [{transform_indices = @transform_0, window_bounds = array<i64: 16, 128>}, {transform_indices = @transform_1, window_bounds = array<i64: 16, 128>}, {transform_indices = @transform_2, window_bounds = array<i64: 1, 8, 128>}, {transform_indices = @transform_3, window_bounds = array<i64: 1, 8, 128>}, {transform_indices = @transform_4, window_bounds = array<i64: 1, 8, 128>}]} {
    %c0_i32 = arith.constant 0 : i32
    %0 = arith.cmpi eq, %arg1, %c0_i32 : i32
    %1 = arith.extui %0 : i1 to i32
    %c0_i32_0 = arith.constant 0 : i32
    %2 = arith.cmpi ne, %1, %c0_i32_0 : i32
    scf.if %2 {
      %cst_26 = arith.constant 0.000000e+00 : f32
      %30 = vector.broadcast %cst_26 : f32 to vector<1x8x128xf32>
      %c0_27 = arith.constant 0 : index
      %c0_28 = arith.constant 0 : index
      %c0_29 = arith.constant 0 : index
      %31 = vector.load %arg4[%c0_27, %c0_28, %c0_29] : memref<1x8x128xf32, #tpu.memory_space<vmem>>, vector<1x8x128xf32>
      tpu.vector_store %arg4[%c0_27, %c0_28, %c0_29], %30 {strides = array<i32>} : memref<1x8x128xf32, #tpu.memory_space<vmem>>, vector<1x8x128xf32>,
      %cst_30 = arith.constant 0.000000e+00 : f32
      %32 = vector.broadcast %cst_30 : f32 to vector<1x8x128xf32>
      %c0_31 = arith.constant 0 : index
      %c0_32 = arith.constant 0 : index
      %c0_33 = arith.constant 0 : index
      %33 = vector.load %arg5[%c0_31, %c0_32, %c0_33] : memref<1x8x128xf32, #tpu.memory_space<vmem>>, vector<1x8x128xf32>
      tpu.vector_store %arg5[%c0_31, %c0_32, %c0_33], %32 {strides = array<i32>} : memref<1x8x128xf32, #tpu.memory_space<vmem>>, vector<1x8x128xf32>,
      %c0_i32_34 = arith.constant 0 : i32
      %34 = vector.broadcast %c0_i32_34 : i32 to vector<1x8x128xi32>
      %c0_35 = arith.constant 0 : index
      %c0_36 = arith.constant 0 : index
      %c0_37 = arith.constant 0 : index
      %35 = vector.load %arg6[%c0_35, %c0_36, %c0_37] : memref<1x8x128xi32, #tpu.memory_space<vmem>>, vector<1x8x128xi32>
      tpu.vector_store %arg6[%c0_35, %c0_36, %c0_37], %34 {strides = array<i32>} : memref<1x8x128xi32, #tpu.memory_space<vmem>>, vector<1x8x128xi32>,
    } else {
    }
    %c0 = arith.constant 0 : index
    %c0_1 = arith.constant 0 : index
    %3 = vector.load %arg2[%c0, %c0_1] : memref<16x128xf32, #tpu.memory_space<vmem>>, vector<16x128xf32>
    %c0_2 = arith.constant 0 : index
    %c0_3 = arith.constant 0 : index
    %4 = vector.load %arg3[%c0_2, %c0_3] : memref<16x128xf32, #tpu.memory_space<vmem>>, vector<16x128xf32>
    %5 = arith.subf %3, %4 : vector<16x128xf32>
    %6 = arith.mulf %5, %5 : vector<16x128xf32>
    %cst = arith.constant 0.000000e+00 : f32
    %7 = vector.broadcast %cst : f32 to vector<16x128xf32>
    %8 = arith.cmpf oeq, %4, %7 : vector<16x128xf32>
    %cst_4 = arith.constant 0.000000e+00 : f32
    %9 = vector.broadcast %cst_4 : f32 to vector<16x128xf32>
    %10 = arith.select %8, %6, %9 : vector<16x128xi1>, vector<16x128xf32>
    %11 = arith.extui %8 : vector<16x128xi1> to vector<16x128xi32>
    %c0_5 = arith.constant 0 : index
    %c0_6 = arith.constant 0 : index
    %c0_7 = arith.constant 0 : index
    %12 = vector.load %arg4[%c0_5, %c0_6, %c0_7] : memref<1x8x128xf32, #tpu.memory_space<vmem>>, vector<1x8x128xf32>
    %13 = vector.shape_cast %6 : vector<16x128xf32> to vector<2x8x128xf32>
    %cst_8 = arith.constant dense<0.000000e+00> : vector<8x128xf32>
    %14 = vector.multi_reduction <add>, %13, %cst_8 [0] : vector<2x8x128xf32> to vector<8x128xf32>
    %15 = vector.shape_cast %14 : vector<8x128xf32> to vector<1x8x128xf32>
    %16 = arith.addf %12, %15 : vector<1x8x128xf32>
    %c0_9 = arith.constant 0 : index
    %c0_10 = arith.constant 0 : index
    %c0_11 = arith.constant 0 : index
    %17 = vector.load %arg4[%c0_9, %c0_10, %c0_11] : memref<1x8x128xf32, #tpu.memory_space<vmem>>, vector<1x8x128xf32>
    tpu.vector_store %arg4[%c0_9, %c0_10, %c0_11], %16 {strides = array<i32>} : memref<1x8x128xf32, #tpu.memory_space<vmem>>, vector<1x8x128xf32>,
    %c0_12 = arith.constant 0 : index
    %c0_13 = arith.constant 0 : index
    %c0_14 = arith.constant 0 : index
    %18 = vector.load %arg5[%c0_12, %c0_13, %c0_14] : memref<1x8x128xf32, #tpu.memory_space<vmem>>, vector<1x8x128xf32>
    %19 = vector.shape_cast %10 : vector<16x128xf32> to vector<2x8x128xf32>
    %cst_15 = arith.constant dense<0.000000e+00> : vector<8x128xf32>
    %20 = vector.multi_reduction <add>, %19, %cst_15 [0] : vector<2x8x128xf32> to vector<8x128xf32>
    %21 = vector.shape_cast %20 : vector<8x128xf32> to vector<1x8x128xf32>
    %22 = arith.addf %18, %21 : vector<1x8x128xf32>
    %c0_16 = arith.constant 0 : index
    %c0_17 = arith.constant 0 : index
    %c0_18 = arith.constant 0 : index
    %23 = vector.load %arg5[%c0_16, %c0_17, %c0_18] : memref<1x8x128xf32, #tpu.memory_space<vmem>>, vector<1x8x128xf32>
    tpu.vector_store %arg5[%c0_16, %c0_17, %c0_18], %22 {strides = array<i32>} : memref<1x8x128xf32, #tpu.memory_space<vmem>>, vector<1x8x128xf32>,
    %c0_19 = arith.constant 0 : index
    %c0_20 = arith.constant 0 : index
    %c0_21 = arith.constant 0 : index
    %24 = vector.load %arg6[%c0_19, %c0_20, %c0_21] : memref<1x8x128xi32, #tpu.memory_space<vmem>>, vector<1x8x128xi32>
    %25 = vector.shape_cast %11 : vector<16x128xi32> to vector<2x8x128xi32>
    %cst_22 = arith.constant dense<0> : vector<8x128xi32>
    %26 = vector.multi_reduction <add>, %25, %cst_22 [0] : vector<2x8x128xi32> to vector<8x128xi32>
    %27 = vector.shape_cast %26 : vector<8x128xi32> to vector<1x8x128xi32>
    %28 = arith.addi %24, %27 : vector<1x8x128xi32>
    %c0_23 = arith.constant 0 : index
    %c0_24 = arith.constant 0 : index
    %c0_25 = arith.constant 0 : index
    %29 = vector.load %arg6[%c0_23, %c0_24, %c0_25] : memref<1x8x128xi32, #tpu.memory_space<vmem>>, vector<1x8x128xi32>
    tpu.vector_store %arg6[%c0_23, %c0_24, %c0_25], %28 {strides = array<i32>} : memref<1x8x128xi32, #tpu.memory_space<vmem>>, vector<1x8x128xi32>,
    return
  }
  func.func @transform_0(%arg0: i32, %arg1: i32) -> (i32, i32) {
    %c1_i32 = arith.constant 1 : i32
    %0 = arith.muli %arg0, %c1_i32 : i32
    %1 = arith.addi %0, %arg1 : i32
    %c0_i32 = arith.constant 0 : i32
    %c0_i32_0 = arith.constant 0 : i32
    return %1, %c0_i32 : i32, i32
  }
  func.func @transform_1(%arg0: i32, %arg1: i32) -> (i32, i32) {
    %c1_i32 = arith.constant 1 : i32
    %0 = arith.muli %arg0, %c1_i32 : i32
    %1 = arith.addi %0, %arg1 : i32
    %c0_i32 = arith.constant 0 : i32
    %c0_i32_0 = arith.constant 0 : i32
    return %1, %c0_i32 : i32, i32
  }
  func.func @transform_2(%arg0: i32, %arg1: i32) -> (i32, i32, i32) {
    %c0_i32 = arith.constant 0 : i32
    %c0_i32_0 = arith.constant 0 : i32
    %c0_i32_1 = arith.constant 0 : i32
    return %arg0, %c0_i32, %c0_i32_0 : i32, i32, i32
  }
  func.func @transform_3(%arg0: i32, %arg1: i32) -> (i32, i32, i32) {
    %c0_i32 = arith.constant 0 : i32
    %c0_i32_0 = arith.constant 0 : i32
    %c0_i32_1 = arith.constant 0 : i32
    return %arg0, %c0_i32, %c0_i32_0 : i32, i32, i32
  }
  func.func @transform_4(%arg0: i32, %arg1: i32) -> (i32, i32, i32) {
    %c0_i32 = arith.constant 0 : i32
    %c0_i32_0 = arith.constant 0 : i32
    %c0_i32_1 = arith.constant 0 : i32
    return %arg0, %c0_i32, %c0_i32_0 : i32, i32, i32
  }
}

</mosaic_0001>

<bundles_post_ra>
// kernel: tpu_custom_call.1
= control target key start
LH: loop header
LB: loop body
LE: loop exit
PB: predicated region body
PF: predicated region fallthrough
CT: control target
= control target key end

     0   :  { %10 = vsyncpa [#allocation3], 0  ;;  %s297_s0 = inlined_call_operand.hbm [shape: f32[16,128], index: 0, kind: input, shape index: {}]   ;;  %s298_s1 = inlined_call_operand.hbm [shape: f32[16,128], index: 1, kind: input, shape index: {}]   ;;  %s299_s2 = inlined_call_operand.hbm [shape: f32[1,8,128], index: 2, kind: output, shape index: {0}]   ;;  %s300_s3 = inlined_call_operand.hbm [shape: f32[1,8,128], index: 3, kind: output, shape index: {1}]   ;;  %s301_s4 = inlined_call_operand.hbm [shape: s32[1,8,128], index: 4, kind: output, shape index: {2}]  }
   0x1   :  { %11 = vsyncpa [#allocation6], 0 }
   0x2   :  { %12 = vsyncpa [#allocation4], 0 }
   0x3   :  { %13 = vsyncpa [#allocation9], 0  ;;  %s249_s15 = smov [#allocation2]  }
   0x4   :  { %s23_s16 = sshll.u32 %s249_s15, 4  ;;  %s24_s16 = int_to_ptr.vmem [resolvable:$true] %s23_s16 }
   0x5   :  { %s149_s17 = scalar_lea.vmem %s24_s16, 256  ;;  %p154_p1 = scmp.lt.s32.totalorder %s24_s16, %s24_s16 }
   0x6   :  { %p150_p0 = scmp.ne.s32.totalorder %s24_s16, %s149_s17  ;;  %p155_p2 = scmp.lt.s32.totalorder %s149_s17, %s149_s17 }
   0x8   :  { %p156_p3 = por %p155_p2, %p154_p1 }
   0xa   :  { %p157_p4 = pnand %p156_p3, %p150_p0 }
   0xc   :  { %160 = shalt.err (!%p157_p4)
}
   0xd   :  { %s250_s18 = smov 128   ;;  %s251_s19 = smov 8  }
   0xe   :  { %29 = dma.hbm_to_vmem [thread:$0]  %s297_s0, 256, %s24_s16, [#allocation3], %s250_s18, %s250_s18, %s251_s19  }
   0xf   :  { %s252_s22 = smov [#allocation5]  }
  0x10   :  { %s39_s23 = sshll.u32 %s252_s22, 4  ;;  %s40_s23 = int_to_ptr.vmem [resolvable:$true] %s39_s23 }
  0x11   :  { %s169_s24 = scalar_lea.vmem %s40_s23, 256  ;;  %p174_p6 = scmp.lt.s32.totalorder %s40_s23, %s40_s23 }
  0x12   :  { %p170_p5 = scmp.ne.s32.totalorder %s40_s23, %s169_s24  ;;  %p175_p7 = scmp.lt.s32.totalorder %s169_s24, %s169_s24 }
  0x14   :  { %p176_p8 = por %p175_p7, %p174_p6 }
  0x16   :  { %p177_p9 = pnand %p176_p8, %p170_p5 }
  0x18   :  { %180 = shalt.err (!%p177_p9)
}
  0x19   :  { %45 = dma.hbm_to_vmem [thread:$0]  %s298_s1, 256, %s40_s23, [#allocation6], %s250_s18, %s250_s18, %s251_s19  }
  0x1a   :  { %241 = dma.done.wait [#allocation3], 256  }
  0x1b   :  { %242 = vsyncadd [#allocation3], 4294967040 }
  0x1c   :  { %243 = dma.done.wait [#allocation6], 256  }
  0x1d   :  { %244 = vsyncadd [#allocation6], 4294967040  ;;  %v63_v0 = vld [vmem:[#allocation2] sm:$0xff]  ;;  %v64_v1 = vld [vmem:[#allocation2 + $0x8] sm:$0xff]  ;;  %v253_v6 = vmov 0   ;;  %s254_s0 = smov [#allocation7]  }
  0x1e   :  { %v65_v2 = vld [vmem:[#allocation5] sm:$0xff]  ;;  %v66_v3 = vld [vmem:[#allocation5 + $0x8] sm:$0xff]  ;;  %s95_s1 = sshll.u32 %s254_s0, 4  ;;  %s255_s27 = smov [#allocation8]   ;;  %s96_s1 = int_to_ptr.vmem [resolvable:$true] %s95_s1 }
  0x1f   :  { %v67_v4 = vsub.f32 %v63_v0, %v65_v2  ;;  %vm71_vm0 = vcmp.eq.f32.partialorder %v65_v2, 0.0  ;;  %v68_v5 = vsub.f32 %v64_v1, %v66_v3  ;;  %vm72_vm1 = vcmp.eq.f32.partialorder %v66_v3, 0.0  ;;  %s105_s28 = sshll.u32 %s255_s27, 4  ;;  %s256_s29 = smov [#allocation10]   ;;  %s106_s28 = int_to_ptr.vmem [resolvable:$true] %s105_s28 }
  0x20   :  { %v75_v7 = vsel %vm71_vm0, 1, %v253_v6  ;;  %v76_v9 = vsel %vm72_vm1, 1, %v253_v6  ;;  %s115_s30 = sshll.u32 %s256_s29, 4  ;;  %s181_s5 = scalar_lea.vmem %s96_s1, 128  ;;  %s116_s30 = int_to_ptr.vmem [resolvable:$true] %s115_s30 }
  0x21   :  { %v69_v8 = vmul.f32 %v67_v4, %v67_v4  ;;  %v70_v10 = vmul.f32 %v68_v5, %v68_v5  ;;  %v86_v11 = vadd.s32 %v76_v9, %v75_v7  ;;  %p182_p10 = scmp.ne.s32.totalorder %s96_s1, %s181_s5  ;;  %p186_p11 = scmp.lt.s32.totalorder %s96_s1, %s96_s1 }
  0x22   :  { %p187_p12 = scmp.lt.s32.totalorder %s181_s5, %s181_s5 }
  0x23   :  { %v73_v12 = vsel %vm71_vm0, %v69_v8, 0.0  ;;  %v74_v13 = vsel %vm72_vm1, %v70_v10, 0.0  ;;  %v78_v14 = vadd.f32 %v70_v10, %v69_v8  ;;  %88 = vst [vmem:[#allocation10] sm:$0xff] %v86_v11 }
  0x24   :  { %v82_v15 = vadd.f32 %v74_v13, %v73_v12  ;;  %p188_p13 = por %p187_p12, %p186_p11 }
  0x25   :  { %80 = vst [vmem:[#allocation7] sm:$0xff] %v78_v14 }
  0x26   :  { %84 = vst [vmem:[#allocation8] sm:$0xff] %v82_v15  ;;  %p189_p0 = pnand %p188_p13, %p182_p10 }
  0x28   :  { %192 = shalt.err (!%p189_p0)
}
  0x29   :  { %98 = dma.vmem_to_hbm [thread:$0]  %s96_s1, 128, %s299_s2, [#allocation4]  }
  0x2a   :  { %s201_s8 = scalar_lea.vmem %s106_s28, 128  ;;  %p206_p2 = scmp.lt.s32.totalorder %s106_s28, %s106_s28 }
  0x2b   :  { %p202_p1 = scmp.ne.s32.totalorder %s106_s28, %s201_s8  ;;  %p207_p3 = scmp.lt.s32.totalorder %s201_s8, %s201_s8 }
  0x2d   :  { %p208_p4 = por %p207_p3, %p206_p2 }
  0x2f   :  { %p209_p5 = pnand %p208_p4, %p202_p1 }
  0x31   :  { %212 = shalt.err (!%p209_p5)
}
  0x32   :  { %108 = dma.vmem_to_hbm [thread:$0]  %s106_s28, 128, %s300_s3, [#allocation9]  }
  0x33   :  { %s221_s11 = scalar_lea.vmem %s116_s30, 128  ;;  %p226_p7 = scmp.lt.s32.totalorder %s116_s30, %s116_s30 }
  0x34   :  { %p222_p6 = scmp.ne.s32.totalorder %s116_s30, %s221_s11  ;;  %p227_p8 = scmp.lt.s32.totalorder %s221_s11, %s221_s11 }
  0x36   :  { %p228_p9 = por %p227_p8, %p226_p7 }
  0x38   :  { %p229_p10 = pnand %p228_p9, %p222_p6 }
  0x3a   :  { %232 = shalt.err (!%p229_p10)
}
  0x3b   :  { %118 = dma.vmem_to_hbm [thread:$0]  %s116_s30, 128, %s301_s4, [#allocation9]  }
  0x3c   :  { %245 = dma.done.wait [#allocation4], 128  }
  0x3d   :  { %246 = vsyncadd [#allocation4], 4294967168 }
  0x3e   :  { %247 = dma.done.wait [#allocation9], 256  }
  0x3f   :  { %248 = vsyncadd [#allocation9], 4294967040 }
  0x40   :  { %128 = vsyncpa [#allocation3], 1 }
  0x41   :  { %129 = vsyncpa [#allocation6], 1 }
  0x42   :  { %130 = vsyncpa [#allocation4], 1 }
  0x43   :  { %131 = vsyncpa [#allocation9], 1 }

</bundles_post_ra>
